<compile_context>
chip_gen: v7x
topology: tpu7x:2x2x1
jax: 0.10.0
libtpu: 0.0.40
codegen_flags: <defaults>
</compile_context>

<pallas_src>
import functools

import jax
import jax.numpy as jnp
from jax.experimental import pallas as pl
from jax.experimental.pallas import tpu as pltpu

_MIB = 1024 * 1024


def _round_up(x, m):
    return ((x + m - 1) // m) * m


def _vmem_capacity_bytes():
    """Physical VMEM of the local TensorCore; conservative fallback (v7x)."""
    try:
        info = pltpu.get_tpu_info()
        cap = getattr(info, "vmem_capacity_bytes", None)
        if cap:
            return int(cap)
    except Exception:
        pass
    return 64 * _MIB


def _focus_conv_kernel(x_ref, w_ref, shift_ref, o_ref):
    # 1x1 conv over channels == (Cout, K) @ (K, ts) matmul on the MXU
    # (bf16 operands, f32 accumulation), then folded-BN shift + SiLU in f32,
    # lane-dense store in the output dtype (bf16 by default).
    y = jnp.dot(w_ref[...], x_ref[0], preferred_element_type=jnp.float32)
    y = y + shift_ref[...]                                  # (Cout, 1) broadcast
    sig = pl.reciprocal(1.0 + jnp.exp(-y), approx=True)     # sigmoid via EUP
    o_ref[0] = (y * sig).astype(o_ref.dtype)                # SiLU


def _choose_spatial_tile(S, num_batch, target_ts, ts_cap, min_steps=8):
    """Pick (tile, padded_S).  tile is a multiple of 128 (or == S for tiny S).
    Padding is bounded by the tile size -- never the old pad-to-target fallback."""
    # Tiny spatial extent: a single full-extent block is legal and optimal.
    if S <= 512:
        return S, S

    s_pad = _round_up(S, 128)

    # Keep enough grid steps to hide DMA latency / feed both cores (v7x).
    steps_wanted = max(1, min_steps // max(num_batch, 1))
    target_ts = min(target_ts, ts_cap,
                    _round_up(pl.cdiv(s_pad, steps_wanted), 128))
    target_ts = max(512, (target_ts // 128) * 128)
    t_max = min(target_ts, s_pad)

    # Prefer the largest multiple-of-128 tile that divides the aligned extent.
    ts = 128
    for cand in range(t_max, 127, -128):
        if s_pad % cand == 0:
            ts = cand
            break

    # Awkward extents (no decent divisor) on large problems: use a moderate
    # tile and pad -- waste is < ts (<= 2047) columns, not thousands.
    if ts < 1024 and s_pad >= 8 * 1024 and t_max >= 1024:
        best = None
        for cand in range(1024, min(2048, t_max) + 1, 128):
            waste = _round_up(s_pad, cand) - s_pad
            if best is None or waste < best[1]:
                best = (cand, waste)
        ts = best[0]
        s_pad = _round_up(s_pad, ts)

    return ts, s_pad


def focus_conv_pallas(x3d, w2d, shift, *, out_dtype=jnp.bfloat16,
                      target_tile_s=16384):
    """x3d: (N, K, S) bf16, w2d: (Cout, K) bf16 (BN scale folded in),
    shift: (Cout, 1) f32.  Returns (N, Cout, S) `out_dtype`."""
    N, K, S = x3d.shape
    Cout = w2d.shape[0]
    out_isz = jnp.dtype(out_dtype).itemsize

    # VMEM budget: bounded limit that is safe on every generation (v7x has only
    # 64 MiB physical per TensorCore), and a hard cap on the spatial tile so the
    # double-buffered blocks + f32 epilogue temporaries always fit.
    vmem_cap = _vmem_capacity_bytes()
    vmem_limit = max(32 * _MIB, min(int(vmem_cap * 0.75), 64 * _MIB))
    bytes_per_lane = (2 * (2 * K)             # double-buffered bf16 input block
                      + 2 * (out_isz * Cout)  # double-buffered output block
                      + 3 * 4 * Cout)         # ~3 live f32 (Cout, ts) temps
    ts_cap = max(512, ((vmem_limit // 2) // bytes_per_lane) // 128 * 128)

    ts, S_pad = _choose_spatial_tile(S, N, target_tile_s, ts_cap)
    if S_pad != S:
        # Padded columns compute SiLU(shift) != 0 but are sliced off below.
        x3d = jnp.pad(x3d, ((0, 0), (0, 0), (0, S_pad - S)))

    grid = (N, S_pad // ts)

    cost = pl.CostEstimate(
        flops=2 * N * S_pad * K * Cout,
        transcendentals=N * S_pad * Cout,
        bytes_accessed=(N * S_pad * K * 2               # bf16 activations in
                        + Cout * K * 2                  # bf16 weights
                        + Cout * 4                      # BN shift
                        + N * S_pad * Cout * out_isz))  # output

    out = pl.pallas_call(
        _focus_conv_kernel,
        out_shape=jax.ShapeDtypeStruct((N, Cout, S_pad), out_dtype),
        grid=grid,
        in_specs=[
            pl.BlockSpec((1, K, ts), lambda n, s: (n, 0, s)),
            pl.BlockSpec((Cout, K), lambda n, s: (0, 0)),
            pl.BlockSpec((Cout, 1), lambda n, s: (0, 0)),
        ],
        out_specs=pl.BlockSpec((1, Cout, ts), lambda n, s: (n, 0, s)),
        compiler_params=pltpu.CompilerParams(
            dimension_semantics=("parallel", "parallel"),
            vmem_limit_bytes=vmem_limit),
        cost_estimate=cost,
    )(x3d, w2d, shift)

    if S_pad != S:
        out = out[:, :, :S]
    return out


def focus_forward(x_nchw, conv_w, bn_gamma, bn_beta, bn_mean, bn_var,
                  eps=1e-5, out_dtype=jnp.bfloat16):
    """Focus.forward: space-to-depth + BaseConv(ksize=1, stride=1, groups=1).

    x_nchw : (N, Cin, H, W) f32
    conv_w : (Cout, 4*Cin, 1, 1) PyTorch Conv2d weight (bias=False)
    bn_*   : (Cout,) BatchNorm2d params / running stats (eval semantics)
    """
    N, Cin, H, W = x_nchw.shape
    Cout = conv_w.shape[0]
    Ho, Wo = H // 2, W // 2
    K = 4 * Cin
    S = Ho * Wo

    # Single fused space-to-depth + layout change + bf16 cast (one XLA pass):
    #   x[n, ci, 2*ho+dh, 2*wo+dw]  ->  X[n, (2*dw+dh)*Cin + ci, ho*Wo + wo]
    # The K ordering (2*dw+dh) matches torch.cat((tl, bl, tr, br), dim=1).
    x6 = x_nchw.reshape(N, Cin, Ho, 2, Wo, 2).astype(jnp.bfloat16)
    x3d = jnp.transpose(x6, (0, 5, 3, 1, 2, 4)).reshape(N, K, S)

    # Fold BN (eval mode) into the 1x1 conv weight (scale) + per-channel shift.
    inv_std = 1.0 / jnp.sqrt(bn_var + eps)
    scale = bn_gamma * inv_std                                  # (Cout,)
    w2d = (conv_w.reshape(Cout, K) * scale[:, None]).astype(jnp.bfloat16)
    shift = (bn_beta - bn_mean * scale).reshape(Cout, 1).astype(jnp.float32)

    out3d = focus_conv_pallas(x3d, w2d, shift, out_dtype=out_dtype)
    return out3d.reshape(N, Cout, Ho, Wo)                       # NCHW, free reshape


def _focus_reference(x, conv_w, g, b, m, v, eps=1e-5):
    """Pure-JAX f32 reference matching the PyTorch module (eval mode)."""
    tl = x[..., ::2, ::2]
    tr = x[..., ::2, 1::2]
    bl = x[..., 1::2, ::2]
    br = x[..., 1::2, 1::2]
    xc = jnp.concatenate((tl, bl, tr, br), axis=1)
    y = jax.lax.conv_general_dilated(
        xc, conv_w, window_strides=(1, 1), padding="VALID",
        dimension_numbers=("NCHW", "OIHW", "NCHW"))
    inv_std = 1.0 / jnp.sqrt(v + eps)
    scale = (g * inv_std)[None, :, None, None]
    shift = (b - m * g * inv_std)[None, :, None, None]
    y = y * scale + shift
    return y * jax.nn.sigmoid(y)


if __name__ == "__main__":
    key = jax.random.PRNGKey(0)
    k_x, k_w, k_g, k_b, k_m, k_v = jax.random.split(key, 6)

    # Small shapes consistent with Focus: batch=2, in_channels=4, spatial=16.
    N, Cin, H, W = 2, 4, 16, 16
    Cout = 8
    K = 4 * Cin

    x = jax.random.normal(k_x, (N, Cin, H, W), dtype=jnp.float32)
    conv_w = 0.1 * jax.random.normal(k_w, (Cout, K, 1, 1), dtype=jnp.float32)
    bn_gamma = 1.0 + 0.1 * jax.random.normal(k_g, (Cout,), dtype=jnp.float32)
    bn_beta = 0.1 * jax.random.normal(k_b, (Cout,), dtype=jnp.float32)
    bn_mean = 0.1 * jax.random.normal(k_m, (Cout,), dtype=jnp.float32)
    bn_var = 0.5 + jnp.abs(jax.random.normal(k_v, (Cout,), dtype=jnp.float32))

    fwd = jax.jit(functools.partial(focus_forward, eps=1e-5))
    out = fwd(x, conv_w, bn_gamma, bn_beta, bn_mean, bn_var)
    jax.block_until_ready(out)

    assert out.shape == (N, Cout, H // 2, W // 2), out.shape

    # Correctness vs pure-JAX f32 reference (tolerance covers bf16 in/out).
    ref = _focus_reference(x, conv_w, bn_gamma, bn_beta, bn_mean, bn_var)
    max_err = float(jnp.max(jnp.abs(out.astype(jnp.float32) - ref)))
    assert max_err < 5e-2, f"max abs error too large: {max_err}"

    print("KERNEL_OK")
</pallas_src>

<mosaic_0001>
module attributes {stable_mosaic.version = 11 : i64} {
  func.func @_focus_conv_kernel(%arg0: i32, %arg1: i32, %arg2: memref<1x16x64xbf16, #tpu.memory_space<vmem>>, %arg3: memref<8x16xbf16, #tpu.memory_space<vmem>>, %arg4: memref<8x1xf32, #tpu.memory_space<vmem>>, %arg5: memref<1x8x64xbf16, #tpu.memory_space<vmem>>) attributes {dimension_semantics = [#tpu.dimension_semantics<parallel>, #tpu.dimension_semantics<parallel>], iteration_bounds = array<i64: 2, 1>, scalar_prefetch = 0 : i64, scratch_operands = 0 : i64, tpu.core_type = #tpu.core_type<tc>, window_params = [{transform_indices = @transform_0, window_bounds = array<i64: 1, 16, 64>}, {pipeline_mode = #tpu.pipeline_mode<synchronous>, transform_indices = @transform_1, window_bounds = array<i64: 8, 16>}, {pipeline_mode = #tpu.pipeline_mode<synchronous>, transform_indices = @transform_2, window_bounds = array<i64: 8, 1>}, {transform_indices = @transform_3, window_bounds = array<i64: 1, 8, 64>}]} {
    %c0 = arith.constant 0 : index
    %c0_0 = arith.constant 0 : index
    %0 = vector.load %arg3[%c0, %c0_0] : memref<8x16xbf16, #tpu.memory_space<vmem>>, vector<8x16xbf16>
    %c0_1 = arith.constant 0 : index
    %c0_2 = arith.constant 0 : index
    %c0_3 = arith.constant 0 : index
    %1 = vector.load %arg2[%c0_1, %c0_2, %c0_3] : memref<1x16x64xbf16, #tpu.memory_space<vmem>>, vector<1x16x64xbf16>
    %2 = vector.shape_cast %1 : vector<1x16x64xbf16> to vector<16x64xbf16>
    %cst = arith.constant dense<0.000000e+00> : vector<8x64xf32>
    %3 = tpu.matmul %0, %2, %cst {dimension_numbers = #tpu.dot_dimension_numbers<[1], [0], [0], [1], [0, 0, 1, 1], [], []>} : vector<8x16xbf16>, vector<16x64xbf16>, vector<8x64xf32> -> vector<8x64xf32>
    %c0_4 = arith.constant 0 : index
    %c0_5 = arith.constant 0 : index
    %4 = vector.load %arg4[%c0_4, %c0_5] : memref<8x1xf32, #tpu.memory_space<vmem>>, vector<8x1xf32>
    %5 = vector.broadcast %4 : vector<8x1xf32> to vector<8x64xf32>
    %6 = arith.addf %3, %5 : vector<8x64xf32>
    %cst_6 = arith.constant 0.000000e+00 : f32
    %7 = vector.broadcast %cst_6 : f32 to vector<8x64xf32>
    %8 = arith.subf %7, %6 : vector<8x64xf32>
    %9 = math.exp %8 : vector<8x64xf32>
    %cst_7 = arith.constant 1.000000e+00 : f32
    %10 = vector.broadcast %cst_7 : f32 to vector<8x64xf32>
    %11 = arith.addf %10, %9 : vector<8x64xf32>
    %12 = tpu.reciprocal %11 {approx = true} : vector<8x64xf32> -> vector<8x64xf32>
    %13 = arith.mulf %6, %12 : vector<8x64xf32>
    %14 = arith.truncf %13 : vector<8x64xf32> to vector<8x64xbf16>
    %c0_8 = arith.constant 0 : index
    %c0_9 = arith.constant 0 : index
    %c0_10 = arith.constant 0 : index
    %15 = vector.load %arg5[%c0_8, %c0_9, %c0_10] : memref<1x8x64xbf16, #tpu.memory_space<vmem>>, vector<1x8x64xbf16>
    %16 = vector.shape_cast %15 : vector<1x8x64xbf16> to vector<8x64xbf16>
    %17 = vector.shape_cast %14 : vector<8x64xbf16> to vector<1x8x64xbf16>
    tpu.vector_store %arg5[%c0_8, %c0_9, %c0_10], %17 {strides = array<i32>} : memref<1x8x64xbf16, #tpu.memory_space<vmem>>, vector<1x8x64xbf16>,
    return
  }
  func.func @transform_0(%arg0: i32, %arg1: i32) -> (i32, i32, i32) {
    %c0_i32 = arith.constant 0 : i32
    %c0_i32_0 = arith.constant 0 : i32
    return %arg0, %c0_i32, %arg1 : i32, i32, i32
  }
  func.func @transform_1(%arg0: i32, %arg1: i32) -> (i32, i32) {
    %c0_i32 = arith.constant 0 : i32
    %c0_i32_0 = arith.constant 0 : i32
    %c0_i32_1 = arith.constant 0 : i32
    return %c0_i32, %c0_i32_0 : i32, i32
  }
  func.func @transform_2(%arg0: i32, %arg1: i32) -> (i32, i32) {
    %c0_i32 = arith.constant 0 : i32
    %c0_i32_0 = arith.constant 0 : i32
    %c0_i32_1 = arith.constant 0 : i32
    return %c0_i32, %c0_i32_0 : i32, i32
  }
  func.func @transform_3(%arg0: i32, %arg1: i32) -> (i32, i32, i32) {
    %c0_i32 = arith.constant 0 : i32
    %c0_i32_0 = arith.constant 0 : i32
    return %arg0, %c0_i32, %arg1 : i32, i32, i32
  }
}

</mosaic_0001>

<bundles_post_ra>
// kernel: focus_forward.1
= control target key start
LH: loop header
LB: loop body
LE: loop exit
PB: predicated region body
PF: predicated region fallthrough
CT: control target
= control target key end

     0   :  { %s447_s12 = smov 0   ;;  %s449_s13 = smov 0   ;;  %s486_s0 = inlined_call_operand.vmem [shape: bf16[2,16,64], index: 0, kind: input, shape index: {}]   ;;  %s487_s1 = inlined_call_operand.vmem [shape: bf16[8,16], index: 1, kind: input, shape index: {}]   ;;  %s488_s2 = inlined_call_operand.vmem [shape: f32[8,1], index: 2, kind: input, shape index: {}]   ;;  %s489_s3 = inlined_call_operand.vmem [shape: bf16[2,8,64], index: 3, kind: output, shape index: {}]  }
   0x1   :  { %s451_s14 = smov 0  }
   0x2 LB: > { %s25_s15 = sadd.s32 1, %s418_s13  ;;  %p350_p0 = scmp.ge.s32.totalorder %s422_s14, 1  ;;  %s422_s14 = sphi %s451_s14, %s13_s14   ;;  %s418_s13 = sphi %s449_s13, %s491_s13   ;;  %s414_s12 = sphi %s447_s12, %s490_s12  }
   0x3   : > { %p27_p1 = scmp.ge.s32.totalorder %s25_s15, 2  ;;  %p156_p2 = scmp.lt.s32.totalorder %s422_s14, 3 }
   0x5   : > { %s493_s15 = smov (%p27_p1, %s25_s15), 0  ;;  %p157_p3 = pnand %p350_p0, %p156_p2 }
   0x6   : > { %p185_p4 = scmp.lt.s32.totalorder (!%p157_p3), %s414_s12, 1  ;;  %v424_v0 = vmov (!%p157_p3), 0.0   ;;  %vm425_vm0 = vmmov (!%p157_p3), 0   ;;  %v204_v1 = vld [vmem:[%s488_s2] sm:$0xff] (!%p157_p3)  ;;  %v426_v2 = vmov (!%p157_p3), 0   ;;  %vm216_vm1 = vcmask (!%p157_p3), 130048  }
   0x7   : > { %160 = sbr.rel (%p157_p3) target bundleno = 268 (0x10c), region = 32  ;;  %361 = vmatprep.subr.bf16.mxu0 (!%p157_p3), %v424_v0  ;;  %363 = vmatprep.mubr.msk.bf16.mxu0 (!%p157_p3), %vm425_vm0, %v424_v0  ;;  %v201_v4 = vld [vmem:[%s487_s1] sm:$0xf] (!%p157_p3)  ;;  %vm267_vm2 = vcmask (!%p157_p3), 519168  }
   0x8   : > { %394 = vset.pattern.permute.xlu0 (!%p157_p3), %v426_v2 }
   0x9   : > { %207 = vperm.xlu0 (!%p157_p3), %394, %v204_v1  }
   0xe   : > { %s495_s12 = smov (!%p185_p4, %s414_s12), 1 }
   0xf   : > { %s358_s18 = sshll.u32 %s495_s12, 3  ;;  %s353_s24 = sshll.u32 %s495_s12, 2 }
  0x10   : > { %s192_s21 = scalar_lea.vmem %s486_s0, %s358_s18  ;;  %s199_s27 = scalar_lea.vmem %s489_s3, %s353_s24 }
  0x11   : > { %v395_v3 = vld [vmem:[%s192_s21] sm:$0xff]  }
  0x12   : > { %362 = vmatpush3.bf16.msra.mxu0 %v395_v3 }
  0x15   : > { %364 = vmatmul.mubr.msk.bf16.vlgmr.msra.gmra.mrb[0].mxu0 %vm216_vm1, %v201_v4 }
  0x88   : > { %v208_v5 = vpop.permute.xlu0 %207 }
  0xe8   : > { %v254_v6 = vpop.f32.mrb[0].mxu0 }
  0xe9   : > { %v255_v7 = vadd.f32 %v254_v6, %v208_v5  ;;  %v365_v8 = vpop.f32.mrb[1].mxu0 }
  0xea   : > { %v257_v9 = vpop.f32.mrb[2].mxu0 }
  0xeb   : > { %v260_v10 = vsub.f32 0.0, %v255_v7  ;;  %v366_v11 = vpop.f32.mrb[3].mxu0 }
  0xed   : > { %v261_v12 = vmul.f32 1.442695, %v260_v10 }
  0xef   : > { %396 = vpow2.f32 %v261_v12 }
  0xf9   : > { %v397_v13 = vpop.eup %396 }
  0xfa   : > { %v263_v14 = vadd.f32 1.0, %v397_v13 }
  0xfc   : > { %398 = vrcp.f32 %v263_v14 }
 0x106   : > { %v399_v15 = vpop.eup %398 }
 0x107   : > { %v265_v16 = vmul.f32 %v399_v15, %v255_v7 }
 0x109   : > { %v266_v17 = vpack.c.bf16 %v265_v16, %v265_v16 }
 0x10b   : > { %268 = vst.msk [vmem:[%s199_s27] sm:$0xf] %vm267_vm2, %v266_v17 }
 0x10c PF: > { %s13_s14 = sadd.s32 1, %s422_s14   ;;  %s490_s12 = smov %s418_s13 }
 0x10d   : > { %p10_p5 = scmp.ge.s32.totalorder %s13_s14, 4   ;;  %s491_s13 = smov %s493_s15 }
 0x10f   :  { %12 = sbr.rel (!%p10_p5) target bundleno = 2 (0x2), region = 62 }

</bundles_post_ra>
